<compile_context>
chip_gen: v7x
topology: tpu7x:2x2x1
jax: 0.10.0
libtpu: 0.0.40
codegen_flags: <defaults>
</compile_context>

<pallas_src>
import numpy as np
import jax
import jax.numpy as jnp
from jax.experimental import pallas as pl
from jax.experimental.pallas import tpu as pltpu

# --- model hyperparameters (small, consistent with the module) --------------
VOCAB = 50
VOCAB_PAD = 64                       # vocab rows padded to a sublane multiple
PAD_ID = VOCAB_PAD - 1               # sentinel id -> all-zero embedding row
EMB_DIM = 32
HIDDEN = 32
KERNEL_SIZES = (1, 3, 5)
NUM_LABELS = 2
B = 2
S = 8
MAX_PAD = max((ks - 1) // 2 for ks in KERNEL_SIZES)      # 2
S_PAD = S + 2 * MAX_PAD                                  # 12
TAPS = sum(KERNEL_SIZES)                                 # 9
K_IN = TAPS * EMB_DIM                                    # 288 im2col depth
FEAT_DIM = HIDDEN * len(KERNEL_SIZES)                    # 96 per-branch feats
FC_IN = FEAT_DIM * 3                                     # 288 merged feats
LANE = 128
OUT_ROWS = 8                                             # one full f32 vreg
BIAS_ROW = 4                         # aux-slab row carrying conv & fc biases
NEG_BIG = float(np.finfo(np.float32).min)                # finite -inf stand-in

# static tap offsets into the MAX_PAD-padded time axis (order matches packing)
TAP_OFFSETS = tuple(MAX_PAD - (ks - 1) // 2 + k
                    for ks in KERNEL_SIZES for k in range(ks))

assert FEAT_DIM + NUM_LABELS <= LANE and 3 * B <= OUT_ROWS


# --- Pallas kernel -----------------------------------------------------------
def siamese_kernel(ids_ref, lens_ref, emb_ref, wconv_ref, waux_ref, out_ref):
    f32 = jnp.float32

    # Embedding gather for both branches as a one-hot matmul (MXU push #1).
    ids = ids_ref[...]                                         # [2B*S_PAD, 1]
    vocab_iota = jax.lax.broadcasted_iota(
        jnp.int32, (2 * B * S_PAD, VOCAB_PAD), 1)
    onehot = (vocab_iota == ids).astype(f32)                   # [48, 64]
    xpad = jnp.dot(onehot, emb_ref[...],
                   preferred_element_type=f32)                 # [48, 32]

    # In-kernel im2col: 9 time-shifted tap blocks per batch row (all-2D ops).
    xcol_rows = []
    for b in range(2 * B):
        base = b * S_PAD
        taps = [xpad[base + off:base + off + S, :] for off in TAP_OFFSETS]
        xcol_rows.append(jnp.concatenate(taps, axis=-1))       # [S, 288]
    xcol = jnp.concatenate(xcol_rows, axis=0)                  # [2B*S, 288]

    # Fused conv for both branches & all kernel sizes (MXU push #2).
    conv = jnp.dot(xcol, wconv_ref[...],
                   preferred_element_type=f32)                 # [2B*S, 128]

    # Length-masked max-pool; mask built per row directly at [S, LANE] layout
    # from SMEM length scalars.  Conv bias added post-pool (max(x)+b == max(x+b)).
    t_iota = jax.lax.broadcasted_iota(jnp.int32, (S, LANE), 0)
    pooled_rows = []
    for b in range(2 * B):
        valid = t_iota < lens_ref[b]
        cb = conv[b * S:(b + 1) * S, :]                        # [S, 128]
        pooled_rows.append(
            jnp.max(jnp.where(valid, cb, NEG_BIG), axis=0, keepdims=True))
    pooled = jnp.concatenate(pooled_rows, axis=0)              # [2B, 128]
    pooled = pooled + waux_ref[BIAS_ROW:BIAS_ROW + 1, 0:LANE]  # conv biases

    o1 = pooled[0:B]                                           # [B, 128]
    o2 = pooled[B:2 * B]                                       # [B, 128]

    # Siamese merge (128-lane-aligned concatenation) + final Linear done as
    # elementwise multiply + lane reduction (VPU/XLU) -- no second MXU push.
    merge = jnp.concatenate([o1 + o2, jnp.abs(o1 - o2), o1 * o2], axis=-1)
    label_cols = [jnp.sum(merge * waux_ref[l:l + 1, :], axis=-1, keepdims=True)
                  for l in range(NUM_LABELS)]                  # each [B, 1]
    logits = (jnp.concatenate(label_cols, axis=-1)
              + waux_ref[BIAS_ROW:BIAS_ROW + 1, LANE:LANE + NUM_LABELS])

    # Single full-vreg output slab: rows 0:B o1 | B:2B o2 | 2B:3B logits | pad.
    logits_pad = jnp.concatenate(
        [logits, jnp.zeros((B, LANE - NUM_LABELS), f32)], axis=-1)
    out_ref[...] = jnp.concatenate(
        [o1, o2, logits_pad, jnp.zeros((OUT_ROWS - 3 * B, LANE), f32)], axis=0)


# --- hoisted (init-time) parameter packing -----------------------------------
def pack_params(params):
    emb_pad = np.zeros((VOCAB_PAD, EMB_DIM), np.float32)
    emb_pad[:VOCAB] = np.asarray(params["emb"])                # rows 50..63 = 0

    wconv = np.zeros((K_IN, LANE), np.float32)                 # block-diagonal
    j = 0
    for ci, ks in enumerate(KERNEL_SIZES):
        w = np.asarray(params["conv_w"][ci])                   # [H, E, ks]
        for k in range(ks):
            wconv[j * EMB_DIM:(j + 1) * EMB_DIM,
                  ci * HIDDEN:(ci + 1) * HIDDEN] = w[:, :, k].T
            j += 1

    waux = np.zeros((OUT_ROWS, 3 * LANE), np.float32)
    fc_w = np.asarray(params["fc_w"])                          # [L, FC_IN]
    for l in range(NUM_LABELS):
        for blk in range(3):
            waux[l, blk * LANE:blk * LANE + FEAT_DIM] = \
                fc_w[l, blk * FEAT_DIM:(blk + 1) * FEAT_DIM]
    waux[BIAS_ROW, 0:FEAT_DIM] = np.concatenate(
        [np.asarray(b) for b in params["conv_b"]])
    waux[BIAS_ROW, LANE:LANE + NUM_LABELS] = np.asarray(params["fc_b"])

    return {"emb_pad": jnp.asarray(emb_pad),
            "wconv": jnp.asarray(wconv),
            "waux": jnp.asarray(waux)}


# --- forward: minimal int-id glue + one pallas_call --------------------------
def siamese_cnn_forward(ids_1, ids_2, lens_1, lens_2, packed):
    ids = jnp.concatenate([ids_1, ids_2], axis=0).astype(jnp.int32)   # [2B, S]
    ids_pad = jnp.pad(ids, ((0, 0), (MAX_PAD, MAX_PAD)),
                      constant_values=PAD_ID).reshape(2 * B * S_PAD, 1)
    lens = jnp.concatenate([lens_1, lens_2]).astype(jnp.int32)        # (2B,)

    vmem = pl.BlockSpec(memory_space=pltpu.MemorySpace.VMEM)
    smem = pl.BlockSpec(memory_space=pltpu.MemorySpace.SMEM)
    out = pl.pallas_call(
        siamese_kernel,
        out_shape=jax.ShapeDtypeStruct((OUT_ROWS, LANE), jnp.float32),
        in_specs=[vmem, smem, vmem, vmem, vmem],
        out_specs=vmem,
    )(ids_pad, lens, packed["emb_pad"], packed["wconv"], packed["waux"])

    o1 = out[0:B, 0:FEAT_DIM]
    o2 = out[B:2 * B, 0:FEAT_DIM]
    logits = out[2 * B:3 * B, 0:NUM_LABELS]
    return logits, o1, o2


# --- deterministic parameter init (shapes from SiameseCNN.__init__) ----------
def init_params(key):
    keys = jax.random.split(key, 2 + 2 * len(KERNEL_SIZES) + 2)
    emb = jax.random.normal(keys[0], (VOCAB, EMB_DIM), jnp.float32)
    emb = emb.at[0].set(0.0)                      # padding_idx=0
    conv_w, conv_b = [], []
    i = 1
    for ks in KERNEL_SIZES:
        bound = 1.0 / np.sqrt(EMB_DIM * ks)
        conv_w.append(jax.random.uniform(keys[i], (HIDDEN, EMB_DIM, ks),
                                         jnp.float32, -bound, bound)); i += 1
        conv_b.append(jax.random.uniform(keys[i], (HIDDEN,),
                                         jnp.float32, -bound, bound)); i += 1
    bound = 1.0 / np.sqrt(FC_IN)
    fc_w = jax.random.uniform(keys[i], (NUM_LABELS, FC_IN),
                              jnp.float32, -bound, bound); i += 1
    fc_b = jax.random.uniform(keys[i], (NUM_LABELS,),
                              jnp.float32, -bound, bound)
    return {"emb": emb, "conv_w": conv_w, "conv_b": conv_b,
            "fc_w": fc_w, "fc_b": fc_b}


# --- pure-JAX reference (mirrors the PyTorch forward) -------------------------
def reference_forward(ids_1, ids_2, lens_1, lens_2, params):
    emb = params["emb"]

    def branch(ids, lens):
        x = jnp.take(emb, ids, axis=0)                     # [B, S, E]
        feats = []
        for ci, ks in enumerate(KERNEL_SIZES):
            pad = (ks - 1) // 2
            xp = jnp.pad(x, ((0, 0), (pad, pad), (0, 0)))
            w = params["conv_w"][ci]                       # [H, E, ks]
            out = jnp.zeros((B, S, HIDDEN), jnp.float32)
            for k in range(ks):
                out = out + jnp.einsum("bse,he->bsh", xp[:, k:k + S, :], w[:, :, k])
            out = out + params["conv_b"][ci][None, None, :]
            t = jnp.arange(S)
            valid = t[None, :, None] < lens[:, None, None]
            out = jnp.where(valid, out, -jnp.inf)
            feats.append(jnp.max(out, axis=1))
        return jnp.concatenate(feats, axis=-1)

    o1, o2 = branch(ids_1, lens_1), branch(ids_2, lens_2)
    merge = jnp.concatenate([o1 + o2, jnp.abs(o1 - o2), o1 * o2], axis=-1)
    logits = merge @ params["fc_w"].T + params["fc_b"][None, :]
    return logits, o1, o2


if __name__ == "__main__":
    key = jax.random.PRNGKey(0)
    kp, k1, k2 = jax.random.split(key, 3)
    params = init_params(kp)
    packed = pack_params(params)        # hoisted: built ONCE, reused per call

    lens_1 = jnp.array([8, 5], dtype=jnp.int32)
    lens_2 = jnp.array([6, 8], dtype=jnp.int32)
    ids_1 = jax.random.randint(k1, (B, S), 1, VOCAB, dtype=jnp.int32)
    ids_2 = jax.random.randint(k2, (B, S), 1, VOCAB, dtype=jnp.int32)
    t = jnp.arange(S)[None, :]
    ids_1 = jnp.where(t < lens_1[:, None], ids_1, 0)   # pad-id beyond length
    ids_2 = jnp.where(t < lens_2[:, None], ids_2, 0)

    fwd = jax.jit(siamese_cnn_forward)
    logits, out1, out2 = jax.block_until_ready(
        fwd(ids_1, ids_2, lens_1, lens_2, packed))

    ref_logits, ref_o1, ref_o2 = reference_forward(ids_1, ids_2, lens_1, lens_2, params)
    assert np.allclose(np.asarray(logits), np.asarray(ref_logits), rtol=1e-4, atol=1e-4)
    assert np.allclose(np.asarray(out1), np.asarray(ref_o1), rtol=1e-4, atol=1e-4)
    assert np.allclose(np.asarray(out2), np.asarray(ref_o2), rtol=1e-4, atol=1e-4)
    print("KERNEL_OK")
</pallas_src>

<mosaic_0001>
module attributes {stable_mosaic.version = 11 : i64} {
  func.func @siamese_kernel(%arg0: memref<48x1xi32, #tpu.memory_space<vmem>>, %arg1: memref<4xi32, #tpu.memory_space<smem>>, %arg2: memref<64x32xf32, #tpu.memory_space<vmem>>, %arg3: memref<288x128xf32, #tpu.memory_space<vmem>>, %arg4: memref<8x384xf32, #tpu.memory_space<vmem>>, %arg5: memref<8x128xf32, #tpu.memory_space<vmem>>) attributes {dimension_semantics = [], scalar_prefetch = 0 : i64, scratch_operands = 0 : i64, tpu.core_type = #tpu.core_type<tc>} {
    %c0 = arith.constant 0 : index
    %c0_0 = arith.constant 0 : index
    %0 = vector.load %arg0[%c0, %c0_0] : memref<48x1xi32, #tpu.memory_space<vmem>>, vector<48x1xi32>
    %1 = tpu.iota {dimensions = array<i32: 1>} : vector<48x64xi32>
    %2 = vector.broadcast %0 : vector<48x1xi32> to vector<48x64xi32>
    %3 = arith.cmpi eq, %1, %2 : vector<48x64xi32>
    %4 = arith.extui %3 : vector<48x64xi1> to vector<48x64xi32>
    %5 = arith.sitofp %4 : vector<48x64xi32> to vector<48x64xf32>
    %c0_1 = arith.constant 0 : index
    %c0_2 = arith.constant 0 : index
    %6 = vector.load %arg2[%c0_1, %c0_2] : memref<64x32xf32, #tpu.memory_space<vmem>>, vector<64x32xf32>
    %cst = arith.constant dense<0.000000e+00> : vector<48x32xf32>
    %7 = tpu.matmul %5, %6, %cst {dimension_numbers = #tpu.dot_dimension_numbers<[1], [0], [0], [1], [0, 0, 1, 1], [], []>} : vector<48x64xf32>, vector<64x32xf32>, vector<48x32xf32> -> vector<48x32xf32>
    %8 = vector.extract_strided_slice %7 {offsets = [2, 0], sizes = [8, 32], strides = [1, 1]} : vector<48x32xf32> to vector<8x32xf32>
    %9 = vector.extract_strided_slice %7 {offsets = [1, 0], sizes = [8, 32], strides = [1, 1]} : vector<48x32xf32> to vector<8x32xf32>
    %10 = vector.extract_strided_slice %7 {offsets = [2, 0], sizes = [8, 32], strides = [1, 1]} : vector<48x32xf32> to vector<8x32xf32>
    %11 = vector.extract_strided_slice %7 {offsets = [3, 0], sizes = [8, 32], strides = [1, 1]} : vector<48x32xf32> to vector<8x32xf32>
    %12 = vector.extract_strided_slice %7 {offsets = [0, 0], sizes = [8, 32], strides = [1, 1]} : vector<48x32xf32> to vector<8x32xf32>
    %13 = vector.extract_strided_slice %7 {offsets = [1, 0], sizes = [8, 32], strides = [1, 1]} : vector<48x32xf32> to vector<8x32xf32>
    %14 = vector.extract_strided_slice %7 {offsets = [2, 0], sizes = [8, 32], strides = [1, 1]} : vector<48x32xf32> to vector<8x32xf32>
    %15 = vector.extract_strided_slice %7 {offsets = [3, 0], sizes = [8, 32], strides = [1, 1]} : vector<48x32xf32> to vector<8x32xf32>
    %16 = vector.extract_strided_slice %7 {offsets = [4, 0], sizes = [8, 32], strides = [1, 1]} : vector<48x32xf32> to vector<8x32xf32>
    %17 = tpu.concatenate %8, %9, %10, %11, %12, %13, %14, %15, %16 in 1 : vector<8x32xf32>, vector<8x32xf32>, vector<8x32xf32>, vector<8x32xf32>, vector<8x32xf32>, vector<8x32xf32>, vector<8x32xf32>, vector<8x32xf32>, vector<8x32xf32> -> vector<8x288xf32>
    %18 = vector.extract_strided_slice %7 {offsets = [14, 0], sizes = [8, 32], strides = [1, 1]} : vector<48x32xf32> to vector<8x32xf32>
    %19 = vector.extract_strided_slice %7 {offsets = [13, 0], sizes = [8, 32], strides = [1, 1]} : vector<48x32xf32> to vector<8x32xf32>
    %20 = vector.extract_strided_slice %7 {offsets = [14, 0], sizes = [8, 32], strides = [1, 1]} : vector<48x32xf32> to vector<8x32xf32>
    %21 = vector.extract_strided_slice %7 {offsets = [15, 0], sizes = [8, 32], strides = [1, 1]} : vector<48x32xf32> to vector<8x32xf32>
    %22 = vector.extract_strided_slice %7 {offsets = [12, 0], sizes = [8, 32], strides = [1, 1]} : vector<48x32xf32> to vector<8x32xf32>
    %23 = vector.extract_strided_slice %7 {offsets = [13, 0], sizes = [8, 32], strides = [1, 1]} : vector<48x32xf32> to vector<8x32xf32>
    %24 = vector.extract_strided_slice %7 {offsets = [14, 0], sizes = [8, 32], strides = [1, 1]} : vector<48x32xf32> to vector<8x32xf32>
    %25 = vector.extract_strided_slice %7 {offsets = [15, 0], sizes = [8, 32], strides = [1, 1]} : vector<48x32xf32> to vector<8x32xf32>
    %26 = vector.extract_strided_slice %7 {offsets = [16, 0], sizes = [8, 32], strides = [1, 1]} : vector<48x32xf32> to vector<8x32xf32>
    %27 = tpu.concatenate %18, %19, %20, %21, %22, %23, %24, %25, %26 in 1 : vector<8x32xf32>, vector<8x32xf32>, vector<8x32xf32>, vector<8x32xf32>, vector<8x32xf32>, vector<8x32xf32>, vector<8x32xf32>, vector<8x32xf32>, vector<8x32xf32> -> vector<8x288xf32>
    %28 = vector.extract_strided_slice %7 {offsets = [26, 0], sizes = [8, 32], strides = [1, 1]} : vector<48x32xf32> to vector<8x32xf32>
    %29 = vector.extract_strided_slice %7 {offsets = [25, 0], sizes = [8, 32], strides = [1, 1]} : vector<48x32xf32> to vector<8x32xf32>
    %30 = vector.extract_strided_slice %7 {offsets = [26, 0], sizes = [8, 32], strides = [1, 1]} : vector<48x32xf32> to vector<8x32xf32>
    %31 = vector.extract_strided_slice %7 {offsets = [27, 0], sizes = [8, 32], strides = [1, 1]} : vector<48x32xf32> to vector<8x32xf32>
    %32 = vector.extract_strided_slice %7 {offsets = [24, 0], sizes = [8, 32], strides = [1, 1]} : vector<48x32xf32> to vector<8x32xf32>
    %33 = vector.extract_strided_slice %7 {offsets = [25, 0], sizes = [8, 32], strides = [1, 1]} : vector<48x32xf32> to vector<8x32xf32>
    %34 = vector.extract_strided_slice %7 {offsets = [26, 0], sizes = [8, 32], strides = [1, 1]} : vector<48x32xf32> to vector<8x32xf32>
    %35 = vector.extract_strided_slice %7 {offsets = [27, 0], sizes = [8, 32], strides = [1, 1]} : vector<48x32xf32> to vector<8x32xf32>
    %36 = vector.extract_strided_slice %7 {offsets = [28, 0], sizes = [8, 32], strides = [1, 1]} : vector<48x32xf32> to vector<8x32xf32>
    %37 = tpu.concatenate %28, %29, %30, %31, %32, %33, %34, %35, %36 in 1 : vector<8x32xf32>, vector<8x32xf32>, vector<8x32xf32>, vector<8x32xf32>, vector<8x32xf32>, vector<8x32xf32>, vector<8x32xf32>, vector<8x32xf32>, vector<8x32xf32> -> vector<8x288xf32>
    %38 = vector.extract_strided_slice %7 {offsets = [38, 0], sizes = [8, 32], strides = [1, 1]} : vector<48x32xf32> to vector<8x32xf32>
    %39 = vector.extract_strided_slice %7 {offsets = [37, 0], sizes = [8, 32], strides = [1, 1]} : vector<48x32xf32> to vector<8x32xf32>
    %40 = vector.extract_strided_slice %7 {offsets = [38, 0], sizes = [8, 32], strides = [1, 1]} : vector<48x32xf32> to vector<8x32xf32>
    %41 = vector.extract_strided_slice %7 {offsets = [39, 0], sizes = [8, 32], strides = [1, 1]} : vector<48x32xf32> to vector<8x32xf32>
    %42 = vector.extract_strided_slice %7 {offsets = [36, 0], sizes = [8, 32], strides = [1, 1]} : vector<48x32xf32> to vector<8x32xf32>
    %43 = vector.extract_strided_slice %7 {offsets = [37, 0], sizes = [8, 32], strides = [1, 1]} : vector<48x32xf32> to vector<8x32xf32>
    %44 = vector.extract_strided_slice %7 {offsets = [38, 0], sizes = [8, 32], strides = [1, 1]} : vector<48x32xf32> to vector<8x32xf32>
    %45 = vector.extract_strided_slice %7 {offsets = [39, 0], sizes = [8, 32], strides = [1, 1]} : vector<48x32xf32> to vector<8x32xf32>
    %46 = vector.extract_strided_slice %7 {offsets = [40, 0], sizes = [8, 32], strides = [1, 1]} : vector<48x32xf32> to vector<8x32xf32>
    %47 = tpu.concatenate %38, %39, %40, %41, %42, %43, %44, %45, %46 in 1 : vector<8x32xf32>, vector<8x32xf32>, vector<8x32xf32>, vector<8x32xf32>, vector<8x32xf32>, vector<8x32xf32>, vector<8x32xf32>, vector<8x32xf32>, vector<8x32xf32> -> vector<8x288xf32>
    %48 = tpu.concatenate %17, %27, %37, %47 in 0 : vector<8x288xf32>, vector<8x288xf32>, vector<8x288xf32>, vector<8x288xf32> -> vector<32x288xf32>
    %c0_3 = arith.constant 0 : index
    %c0_4 = arith.constant 0 : index
    %49 = vector.load %arg3[%c0_3, %c0_4] : memref<288x128xf32, #tpu.memory_space<vmem>>, vector<288x128xf32>
    %cst_5 = arith.constant dense<0.000000e+00> : vector<32x128xf32>
    %50 = tpu.matmul %48, %49, %cst_5 {dimension_numbers = #tpu.dot_dimension_numbers<[1], [0], [0], [1], [0, 0, 1, 1], [], []>} : vector<32x288xf32>, vector<288x128xf32>, vector<32x128xf32> -> vector<32x128xf32>
    %51 = tpu.iota {dimensions = array<i32: 0>} : vector<8x128xi32>
    %c0_6 = arith.constant 0 : index
    %52 = memref.load %arg1[%c0_6] : memref<4xi32, #tpu.memory_space<smem>>
    %53 = vector.broadcast %52 : i32 to vector<8x128xi32>
    %54 = arith.cmpi slt, %51, %53 : vector<8x128xi32>
    %55 = vector.extract_strided_slice %50 {offsets = [0, 0], sizes = [8, 128], strides = [1, 1]} : vector<32x128xf32> to vector<8x128xf32>
    %cst_7 = arith.constant -3.40282347E+38 : f32
    %56 = vector.broadcast %cst_7 : f32 to vector<8x128xf32>
    %57 = arith.select %54, %55, %56 : vector<8x128xi1>, vector<8x128xf32>
    %cst_8 = arith.constant dense<0xFF800000> : vector<128xf32>
    %58 = vector.multi_reduction <maximumf>, %57, %cst_8 [0] : vector<8x128xf32> to vector<128xf32>
    %59 = vector.shape_cast %58 : vector<128xf32> to vector<1x128xf32>
    %c1 = arith.constant 1 : index
    %60 = memref.load %arg1[%c1] : memref<4xi32, #tpu.memory_space<smem>>
    %61 = vector.broadcast %60 : i32 to vector<8x128xi32>
    %62 = arith.cmpi slt, %51, %61 : vector<8x128xi32>
    %63 = vector.extract_strided_slice %50 {offsets = [8, 0], sizes = [8, 128], strides = [1, 1]} : vector<32x128xf32> to vector<8x128xf32>
    %cst_9 = arith.constant -3.40282347E+38 : f32
    %64 = vector.broadcast %cst_9 : f32 to vector<8x128xf32>
    %65 = arith.select %62, %63, %64 : vector<8x128xi1>, vector<8x128xf32>
    %cst_10 = arith.constant dense<0xFF800000> : vector<128xf32>
    %66 = vector.multi_reduction <maximumf>, %65, %cst_10 [0] : vector<8x128xf32> to vector<128xf32>
    %67 = vector.shape_cast %66 : vector<128xf32> to vector<1x128xf32>
    %c2 = arith.constant 2 : index
    %68 = memref.load %arg1[%c2] : memref<4xi32, #tpu.memory_space<smem>>
    %69 = vector.broadcast %68 : i32 to vector<8x128xi32>
    %70 = arith.cmpi slt, %51, %69 : vector<8x128xi32>
    %71 = vector.extract_strided_slice %50 {offsets = [16, 0], sizes = [8, 128], strides = [1, 1]} : vector<32x128xf32> to vector<8x128xf32>
    %cst_11 = arith.constant -3.40282347E+38 : f32
    %72 = vector.broadcast %cst_11 : f32 to vector<8x128xf32>
    %73 = arith.select %70, %71, %72 : vector<8x128xi1>, vector<8x128xf32>
    %cst_12 = arith.constant dense<0xFF800000> : vector<128xf32>
    %74 = vector.multi_reduction <maximumf>, %73, %cst_12 [0] : vector<8x128xf32> to vector<128xf32>
    %75 = vector.shape_cast %74 : vector<128xf32> to vector<1x128xf32>
    %c3 = arith.constant 3 : index
    %76 = memref.load %arg1[%c3] : memref<4xi32, #tpu.memory_space<smem>>
    %77 = vector.broadcast %76 : i32 to vector<8x128xi32>
    %78 = arith.cmpi slt, %51, %77 : vector<8x128xi32>
    %79 = vector.extract_strided_slice %50 {offsets = [24, 0], sizes = [8, 128], strides = [1, 1]} : vector<32x128xf32> to vector<8x128xf32>
    %cst_13 = arith.constant -3.40282347E+38 : f32
    %80 = vector.broadcast %cst_13 : f32 to vector<8x128xf32>
    %81 = arith.select %78, %79, %80 : vector<8x128xi1>, vector<8x128xf32>
    %cst_14 = arith.constant dense<0xFF800000> : vector<128xf32>
    %82 = vector.multi_reduction <maximumf>, %81, %cst_14 [0] : vector<8x128xf32> to vector<128xf32>
    %83 = vector.shape_cast %82 : vector<128xf32> to vector<1x128xf32>
    %84 = tpu.concatenate %59, %67, %75, %83 in 0 : vector<1x128xf32>, vector<1x128xf32>, vector<1x128xf32>, vector<1x128xf32> -> vector<4x128xf32>
    %c4 = arith.constant 4 : index
    %c0_15 = arith.constant 0 : index
    %85 = vector.load %arg4[%c4, %c0_15] : memref<8x384xf32, #tpu.memory_space<vmem>>, vector<1x128xf32>
    %86 = vector.broadcast %85 : vector<1x128xf32> to vector<4x128xf32>
    %87 = arith.addf %84, %86 : vector<4x128xf32>
    %88 = vector.extract_strided_slice %87 {offsets = [0, 0], sizes = [2, 128], strides = [1, 1]} : vector<4x128xf32> to vector<2x128xf32>
    %89 = vector.extract_strided_slice %87 {offsets = [2, 0], sizes = [2, 128], strides = [1, 1]} : vector<4x128xf32> to vector<2x128xf32>
    %90 = arith.addf %88, %89 : vector<2x128xf32>
    %91 = arith.subf %88, %89 : vector<2x128xf32>
    %92 = math.absf %91 : vector<2x128xf32>
    %93 = arith.mulf %88, %89 : vector<2x128xf32>
    %94 = tpu.concatenate %90, %92, %93 in 1 : vector<2x128xf32>, vector<2x128xf32>, vector<2x128xf32> -> vector<2x384xf32>
    %c0_16 = arith.constant 0 : index
    %c0_17 = arith.constant 0 : index
    %95 = vector.load %arg4[%c0_16, %c0_17] : memref<8x384xf32, #tpu.memory_space<vmem>>, vector<1x384xf32>
    %96 = vector.broadcast %95 : vector<1x384xf32> to vector<2x384xf32>
    %97 = arith.mulf %94, %96 : vector<2x384xf32>
    %cst_18 = arith.constant dense<0.000000e+00> : vector<2xf32>
    %98 = vector.multi_reduction <add>, %97, %cst_18 [1] : vector<2x384xf32> to vector<2xf32>
    %99 = vector.shape_cast %98 : vector<2xf32> to vector<2x1xf32>
    %c1_19 = arith.constant 1 : index
    %c0_20 = arith.constant 0 : index
    %100 = vector.load %arg4[%c1_19, %c0_20] : memref<8x384xf32, #tpu.memory_space<vmem>>, vector<1x384xf32>
    %101 = vector.broadcast %100 : vector<1x384xf32> to vector<2x384xf32>
    %102 = arith.mulf %94, %101 : vector<2x384xf32>
    %cst_21 = arith.constant dense<0.000000e+00> : vector<2xf32>
    %103 = vector.multi_reduction <add>, %102, %cst_21 [1] : vector<2x384xf32> to vector<2xf32>
    %104 = vector.shape_cast %103 : vector<2xf32> to vector<2x1xf32>
    %105 = tpu.concatenate %99, %104 in 1 : vector<2x1xf32>, vector<2x1xf32> -> vector<2x2xf32>
    %c4_22 = arith.constant 4 : index
    %c128 = arith.constant 128 : index
    %106 = vector.load %arg4[%c4_22, %c128] : memref<8x384xf32, #tpu.memory_space<vmem>>, vector<1x2xf32>
    %107 = vector.broadcast %106 : vector<1x2xf32> to vector<2x2xf32>
    %108 = arith.addf %105, %107 : vector<2x2xf32>
    %cst_23 = arith.constant 0.000000e+00 : f32
    %109 = vector.broadcast %cst_23 : f32 to vector<2x126xf32>
    %110 = tpu.concatenate %108, %109 in 1 : vector<2x2xf32>, vector<2x126xf32> -> vector<2x128xf32>
    %cst_24 = arith.constant 0.000000e+00 : f32
    %111 = vector.broadcast %cst_24 : f32 to vector<2x128xf32>
    %112 = tpu.concatenate %88, %89, %110, %111 in 0 : vector<2x128xf32>, vector<2x128xf32>, vector<2x128xf32>, vector<2x128xf32> -> vector<8x128xf32>
    %c0_25 = arith.constant 0 : index
    %c0_26 = arith.constant 0 : index
    %113 = vector.load %arg5[%c0_25, %c0_26] : memref<8x128xf32, #tpu.memory_space<vmem>>, vector<8x128xf32>
    tpu.vector_store %arg5[%c0_25, %c0_26], %112 {strides = array<i32>} : memref<8x128xf32, #tpu.memory_space<vmem>>, vector<8x128xf32>,
    return
  }
}

</mosaic_0001>

<bundles_post_ra>
// kernel: siamese_cnn_forward.1
= control target key start
LH: loop header
LB: loop body
LE: loop exit
PB: predicated region body
PF: predicated region fallthrough
CT: control target
= control target key end

     0   :  { %10 = vsyncpa [#allocation4], 0  ;;  %s1351_s0 = inlined_call_operand.vmem [shape: s32[48,1], index: 0, kind: input, shape index: {}]   ;;  %s1352_s1 = inlined_call_operand.vmem [shape: s32[4], index: 1, kind: input, shape index: {}]   ;;  %s1353_s2 = inlined_call_operand.vmem [shape: f32[64,32], index: 2, kind: input, shape index: {}]   ;;  %s1354_s3 = inlined_call_operand.hbm [shape: f32[288,128], index: 3, kind: input, shape index: {}]   ;;  %s1355_s4 = inlined_call_operand.vmem [shape: f32[8,384], index: 4, kind: input, shape index: {}]   ;;  %s1356_s5 = inlined_call_operand.vmem [shape: f32[8,128], index: 5, kind: output, shape index: {}]  }
   0x1   :  { %s20_s20 = sshll.u32 %s1352_s1, 4  ;;  %s21_s20 = int_to_ptr.vmem [resolvable:$true] %s20_s20 }
   0x2   :  { %11 = vsyncpa [#allocation3], 0  ;;  %s1031_s21 = scalar_lea.vmem %s21_s20, 16  ;;  %p1036_p1 = scmp.lt.s32.totalorder %s21_s20, %s21_s20 }
   0x3   :  { %p1032_p0 = scmp.ne.s32.totalorder %s21_s20, %s1031_s21  ;;  %p1037_p2 = scmp.lt.s32.totalorder %s1031_s21, %s1031_s21 }
   0x5   :  { %p1038_p3 = por %p1037_p2, %p1036_p1 }
   0x7   :  { %p1039_p4 = pnand %p1038_p3, %p1032_p0 }
   0x9   :  { %1042 = shalt.err (!%p1039_p4)
}
   0xa   :  { %s1069_s22 = smov [#allocation2]   ;;  %s1070_s23 = smov [#allocation5]  }
   0xb   :  { %23 = dma.vmem_to_smem %s21_s20, 16, %s1069_s22, [#allocation4]  }
   0xc   :  { %s31_s24 = sshll.u32 %s1070_s23, 4  ;;  %s1043_s27 = scalar_lea.hbm %s1354_s3, 4608  ;;  %s32_s24 = int_to_ptr.vmem [resolvable:$true] %s31_s24 }
   0xd   :  { %p1044_p5 = scmp.ne.s32.totalorder %s1354_s3, %s1043_s27  ;;  %p1047_p6 = scmp.lt.u32.totalorder %s1043_s27, %s1354_s3 }
   0xf   :  { %p1049_p7 = pnand %p1047_p6, %p1044_p5 }
  0x11   :  { %1052 = shalt.err (!%p1049_p7)
}
  0x12   :  { %s1053_s6 = scalar_lea.vmem %s32_s24, 4608  ;;  %p1058_p9 = scmp.lt.s32.totalorder %s32_s24, %s32_s24 }
  0x13   :  { %p1054_p8 = scmp.ne.s32.totalorder %s32_s24, %s1053_s6  ;;  %p1059_p10 = scmp.lt.s32.totalorder %s1053_s6, %s1053_s6 }
  0x15   :  { %p1060_p11 = por %p1059_p10, %p1058_p9 }
  0x17   :  { %p1061_p12 = pnand %p1060_p11, %p1054_p8 }
  0x19   :  { %1064 = shalt.err (!%p1061_p12)
}
  0x1a   :  { %s1071_s7 = smov 128   ;;  %s1072_s8 = smov 8  }
  0x1b   :  { %37 = dma.hbm_to_vmem [thread:$0]  %s1354_s3, 4608, %s32_s24, [#allocation3], %s1071_s7, %s1071_s7, %s1072_s8  }
  0x1c   :  { %1065 = dma.done.wait [#allocation4], 16  }
  0x1d   :  { %1066 = vsyncadd [#allocation4], 4294967280 }
  0x1e   :  { %1067 = dma.done.wait [#allocation3], 4608  }
  0x1f   :  { %1068 = vsyncadd [#allocation3], 4294962688 }
  0x20   :  { %46 = sfence }
  0x21   :  { %v49_v0 = vld [vmem:[%s1351_s0 + $0x10] sm:$0xff]  ;;  %v47_v1 = vld [vmem:[%s1351_s0] sm:$0xff]  ;;  %v1073_v2 = vmov 0   ;;  %v92_v4 = vld [vmem:[%s1353_s2 + $0x8] sm:$0xff]  ;;  %v53_v19 = vlaneseq  ;;  %vm99_vm0 = vcmask 523264   ;;  %v1074_v23 = vmov 0.0  }
  0x22   :  { %975 = vset.pattern.permute.xlu1 %v1073_v2  ;;  %974 = vset.pattern.permute.xlu0 %v1073_v2  ;;  %v91_v3 = vld [vmem:[%s1353_s2] sm:$0xff]  ;;  %v93_v5 = vld [vmem:[%s1353_s2 + $0x10] sm:$0xff]  ;;  %v50_v6 = vld [vmem:[%s1351_s0 + $0x18] sm:$0xff]  ;;  %vm215_vm7 = vcmask 1040384   ;;  %vm243_vm8 = vcmask 1045504   ;;  %vm231_vm9 = vcmask 1046528  }
  0x23   :  { %62 = vperm.xlu1 %975, %v49_v0   ;;  %56 = vperm.xlu0 %974, %v47_v1   ;;  %v48_v7 = vld [vmem:[%s1351_s0 + $0x8] sm:$0xff]  ;;  %v909_v8 = vpack.c.bf16 %v92_v4, %v91_v3  ;;  %v94_v9 = vld [vmem:[%s1353_s2 + $0x18] sm:$0xff]  ;;  %v95_v11 = vld [vmem:[%s1353_s2 + $0x20] sm:$0xff]  ;;  %v54_v20 = vand.u32 127, %v53_v19  ;;  %vm247_vm10 = vcmask 261120   ;;  %vm281_vm11 = vcmask 1041408  }
  0x24   :  { %v913_v10 = vpack.c.bf16 %v94_v9, %v93_v5  ;;  %v96_v12 = vld [vmem:[%s1353_s2 + $0x28] sm:$0xff]  ;;  %v51_v14 = vld [vmem:[%s1351_s0 + $0x20] sm:$0xff]  ;;  %v97_v16 = vld [vmem:[%s1353_s2 + $0x30] sm:$0xff]  ;;  %s1077_s12 = smov 96   ;;  %vm252_vm12 = vcmask 785408   ;;  %s655_s13 = sld [smem:[#allocation2]] }
  0x25   :  { %910 = vmatprep.subr.bf16.mxu0 %v909_v8  ;;  %v52_v13 = vld [vmem:[%s1351_s0 + $0x28] sm:$0xff]  ;;  %v917_v15 = vpack.c.bf16 %v96_v12, %v95_v11  ;;  %v98_v17 = vld [vmem:[%s1353_s2 + $0x38] sm:$0xff]  ;;  %v471_v34 = vld [vmem:[#allocation5 + $0x100] sm:$0xff]  ;;  %s1075_s0 = smov 64   ;;  %s1076_s2 = smov 32  }
  0x26   :  { %912 = vmatpush3.bf16.msra.mxu0 %v909_v8  ;;  %v921_v18 = vpack.c.bf16 %v98_v17, %v97_v16  ;;  %v472_v35 = vld [vmem:[#allocation5 + $0x108] sm:$0xff]  ;;  %v473_v37 = vld [vmem:[#allocation5 + $0x110] sm:$0xff]  ;;  %v474_v38 = vld [vmem:[#allocation5 + $0x118] sm:$0xff]  ;;  %s800_s14 = sld [smem:[#allocation2 + $0x1]]  ;;  %s801_s15 = sld [smem:[#allocation2 + $0x2]] }
  0x27   :  { %65 = vperm.xlu1 %975, %v50_v6   ;;  %59 = vperm.xlu0 %974, %v48_v7   ;;  %v957_v36 = vpack.c.bf16 %v472_v35, %v471_v34  ;;  %v961_v39 = vpack.c.bf16 %v474_v38, %v473_v37  ;;  %v455_v40 = vld [vmem:[#allocation5 + $0x80] sm:$0xff]  ;;  %v456_v41 = vld [vmem:[#allocation5 + $0x88] sm:$0xff]  ;;  %v457_v45 = vld [vmem:[#allocation5 + $0x90] sm:$0xff]  ;;  %s802_s3 = sld [smem:[#allocation2 + $0x3]] }
  0x28   :  { %914 = vmatprep.subr.bf16.mxu0 %v913_v10  ;;  %v439_v42 = vld [vmem:[#allocation5] sm:$0xff]  ;;  %v925_v43 = vpack.c.bf16 %v456_v41, %v455_v40  ;;  %v440_v44 = vld [vmem:[#allocation5 + $0x8] sm:$0xff]  ;;  %v458_v46 = vld [vmem:[#allocation5 + $0x98] sm:$0xff] }
  0x29   :  { %v927_v47 = vpack.c.bf16 %v440_v44, %v439_v42  ;;  %v929_v48 = vpack.c.bf16 %v458_v46, %v457_v45  ;;  %v441_v49 = vld [vmem:[#allocation5 + $0x10] sm:$0xff]  ;;  %v442_v50 = vld [vmem:[#allocation5 + $0x18] sm:$0xff]  ;;  %v459_v51 = vld [vmem:[#allocation5 + $0xa0] sm:$0xff] }
  0x2a   :  { %916 = vmatpush3.bf16.msra.mxu0 %v913_v10  ;;  %926 = vmatprep.subr.bf16.mxu1 %v925_v43  ;;  %v460_v52 = vld [vmem:[#allocation5 + $0xa8] sm:$0xff]  ;;  %v931_v53 = vpack.c.bf16 %v442_v50, %v441_v49  ;;  %v443_v55 = vld [vmem:[#allocation5 + $0x20] sm:$0xff]  ;;  %v461_v57 = vld [vmem:[#allocation5 + $0xb0] sm:$0xff] }
  0x2b   :  { %71 = vperm.xlu1 %975, %v52_v13   ;;  %68 = vperm.xlu0 %974, %v51_v14   ;;  %v933_v54 = vpack.c.bf16 %v460_v52, %v459_v51  ;;  %v444_v56 = vld [vmem:[#allocation5 + $0x28] sm:$0xff]  ;;  %v462_v58 = vld [vmem:[#allocation5 + $0xb8] sm:$0xff]  ;;  %v445_v61 = vld [vmem:[#allocation5 + $0x30] sm:$0xff] }
  0x2c   :  { %918 = vmatprep.subr.bf16.mxu0 %v917_v15  ;;  %928 = vmatpush3.bf16.msra.mxu1 %v927_v47  ;;  %v935_v59 = vpack.c.bf16 %v444_v56, %v443_v55  ;;  %v937_v60 = vpack.c.bf16 %v462_v58, %v461_v57  ;;  %v446_v62 = vld [vmem:[#allocation5 + $0x38] sm:$0xff]  ;;  %v463_v63 = vld [vmem:[#allocation5 + $0xc0] sm:$0xff]  ;;  %v464_v0 = vld [vmem:[#allocation5 + $0xc8] sm:$0xff] }
  0x2d   :  { %930 = vmatprep.subr.bf16.mxu1 %v929_v48  ;;  %v939_v1 = vpack.c.bf16 %v446_v62, %v445_v61  ;;  %v941_v2 = vpack.c.bf16 %v464_v0, %v463_v63  ;;  %v447_v3 = vld [vmem:[#allocation5 + $0x40] sm:$0xff]  ;;  %v448_v4 = vld [vmem:[#allocation5 + $0x48] sm:$0xff]  ;;  %v465_v6 = vld [vmem:[#allocation5 + $0xd0] sm:$0xff] }
  0x2e   :  { %920 = vmatpush3.bf16.msra.mxu0 %v917_v15  ;;  %v943_v5 = vpack.c.bf16 %v448_v4, %v447_v3  ;;  %v466_v7 = vld [vmem:[#allocation5 + $0xd8] sm:$0xff]  ;;  %v449_v9 = vld [vmem:[#allocation5 + $0x50] sm:$0xff]  ;;  %v467_v12 = vld [vmem:[#allocation5 + $0xe0] sm:$0xff] }
  0x2f   :  { %922 = vmatprep.subr.bf16.mxu0 %v921_v18  ;;  %v945_v8 = vpack.c.bf16 %v466_v7, %v465_v6  ;;  %v450_v10 = vld [vmem:[#allocation5 + $0x58] sm:$0xff]  ;;  %v468_v13 = vld [vmem:[#allocation5 + $0xe8] sm:$0xff]  ;;  %v451_v15 = vld [vmem:[#allocation5 + $0x60] sm:$0xff] }
  0x30   :  { %932 = vmatpush3.bf16.msra.mxu1 %v931_v53  ;;  %v947_v11 = vpack.c.bf16 %v450_v10, %v449_v9  ;;  %v949_v14 = vpack.c.bf16 %v468_v13, %v467_v12  ;;  %v452_v16 = vld [vmem:[#allocation5 + $0x68] sm:$0xff] }
  0x31   :  { %934 = vmatprep.subr.bf16.mxu1 %v933_v54  ;;  %v951_v17 = vpack.c.bf16 %v452_v16, %v451_v15 }
  0x32   :  { %924 = vmatpush3.bf16.msra.mxu0 %v921_v18 }
  0x33   :  { %958 = vmatprep.subr.bf16.mxu0 %v957_v36 }
  0x34   :  { %936 = vmatpush3.bf16.msra.mxu1 %v935_v59 }
  0x35   :  { %938 = vmatprep.subr.bf16.mxu1 %v937_v60 }
  0x38   :  { %940 = vmatpush3.bf16.msra.mxu1 %v939_v1 }
  0x39   :  { %942 = vmatprep.subr.bf16.mxu1 %v941_v2 }
  0x3c   :  { %944 = vmatpush3.bf16.msra.mxu1 %v943_v5 }
  0x3d   :  { %946 = vmatprep.subr.bf16.mxu1 %v945_v8 }
  0x40   :  { %948 = vmatpush3.bf16.msra.mxu1 %v947_v11 }
  0x41   :  { %950 = vmatprep.subr.bf16.mxu1 %v949_v14 }
  0x44   :  { %952 = vmatpush3.bf16.msra.mxu1 %v951_v17 }
  0xa2   :  { %v63_v21 = vpop.permute.xlu1 %62  ;;  %v57_v22 = vpop.permute.xlu0 %56 }
  0xa3   :  { %vm73_vm1 = vcmp.eq.s32.totalorder %v54_v20, %v57_v22  ;;  %vm75_vm2 = vcmp.eq.s32.totalorder %v54_v20, %v63_v21  ;;  %v470_v21 = vld [vmem:[#allocation5 + $0xf8] sm:$0xff] }
  0xa4   :  { %v782_v24 = vsel %vm73_vm1, 1.0, %v1074_v23  ;;  %v784_v27 = vsel %vm75_vm2, 1.0, %v1074_v23  ;;  %vm697_vm1 = vcmask 1042432   ;;  %vm763_vm2 = vcmask 7168  }
  0xa5   :  { %886 = vmatprep.mubr.msk.f32.mxu0 %vm99_vm0, %v782_v24 }
  0xa6   :  { %v66_v25 = vpop.permute.xlu1 %65  ;;  %v60_v26 = vpop.permute.xlu0 %59 }
  0xa7   :  { %vm74_vm3 = vcmp.eq.s32.totalorder %v54_v20, %v60_v26  ;;  %vm76_vm4 = vcmp.eq.s32.totalorder %v54_v20, %v66_v25  ;;  %v453_v26 = vld [vmem:[#allocation5 + $0x70] sm:$0xff] }
  0xa8   :  { %v783_v28 = vsel %vm74_vm3, 1.0, %v1074_v23  ;;  %v785_v31 = vsel %vm76_vm4, 1.0, %v1074_v23  ;;  %vm767_vm3 = vcmask 15360   ;;  %vm772_vm4 = vcmask 1043456  }
  0xa9   :  { %887 = vmatmul.mubr.msk.f32.vlgmr.msra.gmra.mrb[0].mxu0 %vm99_vm0, %v783_v28 }
  0xaa   :  { %v72_v29 = vpop.permute.xlu1 %71  ;;  %v69_v30 = vpop.permute.xlu0 %68  ;;  %889 = vmatprep.mubr.msk.f32.mxu0 %vm99_vm0, %v784_v27  ;;  %960 = vmatpush3.bf16.msra.mxu0 %v957_v36 }
  0xab   :  { %vm77_vm5 = vcmp.eq.s32.totalorder %v54_v20, %v69_v30  ;;  %vm78_vm6 = vcmp.eq.s32.totalorder %v54_v20, %v72_v29  ;;  %962 = vmatprep.subr.bf16.mxu0 %v961_v39  ;;  %v469_v20 = vld [vmem:[#allocation5 + $0xf0] sm:$0xff] }
  0xac   :  { %v786_v32 = vsel %vm77_vm5, 1.0, %v1074_v23  ;;  %v787_v33 = vsel %vm78_vm6, 1.0, %v1074_v23 }
  0xad   :  { %890 = vmatmul.mubr.msk.f32.gmra.mrb[2].mxu0 %vm99_vm0, %v785_v31  ;;  %v454_v31 = vld [vmem:[#allocation5 + $0x78] sm:$0xff] }
  0xae   :  { %892 = vmatprep.mubr.msk.f32.mxu0 %vm99_vm0, %v786_v32  ;;  %964 = vmatpush3.bf16.msra.mxu0 %v961_v39  ;;  %v953_v32 = vpack.c.bf16 %v470_v21, %v469_v20 }
  0xb0   :  { %954 = vmatprep.subr.bf16.mxu1 %v953_v32 }
  0xb1   :  { %893 = vmatmul.mubr.msk.f32.gmra.mrb[4].mxu0 %vm99_vm0, %v787_v33  ;;  %v955_v33 = vpack.c.bf16 %v454_v31, %v453_v26 }
  0xb3   :  { %956 = vmatpush3.bf16.msra.mxu1 %v955_v33 }
 0x17c   :  { %v1172_v18 = vpop.f32.mrb[0].mxu0 }
 0x17d   :  { %v1174_v22 = vpop.f32.mrb[1].mxu0  ;;  %v217_v23 = vrot.slane %v1172_v18, 7  ;;  %v245_v24 = vrot.slane %v1172_v18, 2  ;;  %v233_v25 = vrot.slane %v1172_v18, 1  ;;  %v282_v38 = vrot.slane %v1172_v18, 6 }
 0x17e   :  { %v244_v27 = vrot.slane %v1174_v22, 2  ;;  %v976_v28 = vpack.i.bf16 %v1172_v18, %v1174_v22  ;;  %v216_v29 = vrot.slane %v1174_v22, 7  ;;  %v232_v30 = vrot.slane %v1174_v22, 1 }
 0x17f   :  { %v392_v42 = vrot.slane %v245_v24, 2  ;;  %v241_v20 = vrot.slane %v1174_v22, 6 }
 0x180   :  { %977 = vrot.lane.b32.xlu1 %v976_v28, %s1075_s0  ;;  %v1185_v34 = vpop.f32.mrb[2].mxu0  ;;  %v218_v35 = vsel %vm215_vm7, %v216_v29, %v217_v23  ;;  %v246_v36 = vsel %vm243_vm8, %v244_v27, %v245_v24  ;;  %v234_v37 = vsel %vm231_vm9, %v232_v30, %v233_v25 }
 0x181   :  { %v1191_v39 = vpop.f32.mrb[3].mxu0  ;;  %v981_v40 = vpack.i.bf16 %v218_v35, %v216_v29  ;;  %v391_v41 = vrot.slane %v246_v36, 2  ;;  %v986_v43 = vpack.i.bf16 %v233_v25, %v234_v37  ;;  %v328_v48 = vrot.slane %v1185_v34, 2 }
 0x182   :  { %v283_v44 = vrot.slane %v1191_v39, 6  ;;  %v262_v45 = vrot.slane %v1191_v39, 7  ;;  %v991_v46 = vpack.i.bf16 %v1185_v34, %v1191_v39  ;;  %v273_v47 = vrot.slane %v1191_v39, 1 }
 0x183   :  { %982 = vrot.lane.b32.xlu0 %v981_v40, %s1076_s2  ;;  %v393_v49 = vsel %vm243_vm8, %v391_v41, %v392_v42  ;;  %v302_v53 = vrot.slane %v1185_v34, 7  ;;  %v317_v0 = vrot.slane %v1185_v34, 1 }
 0x184   :  { %v1201_v50 = vpop.f32.mrb[4].mxu0  ;;  %903 = vmatprep.mubr.msk.f32.mxu0 %vm247_vm10, %v393_v49  ;;  %v263_v51 = vsel %vm215_vm7, %v217_v23, %v262_v45  ;;  %v274_v52 = vsel %vm231_vm9, %v233_v25, %v273_v47  ;;  %v1210_v54 = vsel %vm281_vm11, %v282_v38, %v283_v44 }
 0x185   :  { %v364_v55 = vrot.slane %v1201_v50, 6  ;;  %v1213_v56 = vpop.f32.mrb[5].mxu0  ;;  %904 = vmatmul.mubr.msk.f32.vlgmr.msra.gmra.mrb[6].mxu0 %vm247_vm10, %v1191_v39  ;;  %v996_v57 = vpack.i.bf16 %v263_v51, %v217_v23  ;;  %v1001_v58 = vpack.i.bf16 %v273_v47, %v274_v52  ;;  %v344_v59 = vrot.slane %v1201_v50, 7 }
 0x186   :  { %v329_v60 = vrot.slane %v1213_v56, 2  ;;  %v1006_v61 = vpack.i.bf16 %v1201_v50, %v1213_v56  ;;  %v303_v62 = vrot.slane %v1213_v56, 7  ;;  %v318_v63 = vrot.slane %v1213_v56, 1 }
 0x187   :  { %987 = vrot.lane.b32.xlu0 %v986_v43, %s1077_s12  ;;  %997 = vrot.lane.b32.xlu1 %v996_v57, %s1076_s2  ;;  %v355_v1 = vrot.slane %v1201_v50, 1  ;;  %v363_v2 = vrot.slane %v1213_v56, 6 }
 0x188   :  { %v330_v3 = vsel %vm243_vm8, %v328_v48, %v329_v60  ;;  %v421_v4 = vrot.slane %v329_v60, 2  ;;  %v304_v5 = vsel %vm215_vm7, %v302_v53, %v303_v62  ;;  %v345_v6 = vsel %vm215_vm7, %v303_v62, %v344_v59 }
 0x189   :  { %v420_v7 = vrot.slane %v330_v3, 2  ;;  %v1011_v8 = vpack.i.bf16 %v304_v5, %v302_v53  ;;  %v1021_v9 = vpack.i.bf16 %v345_v6, %v303_v62  ;;  %v319_v10 = vsel %vm231_vm9, %v317_v0, %v318_v63 }
 0x18a   :  { %v1016_v11 = vpack.i.bf16 %v318_v63, %v319_v10  ;;  %v356_v12 = vsel %vm231_vm9, %v318_v63, %v355_v1  ;;  %v1235_v13 = vsel %vm281_vm11, %v363_v2, %v364_v55 }
 0x18b   :  { %992 = vrot.lane.b32.xlu0 %v991_v46, %s1075_s0  ;;  %1002 = vrot.lane.b32.xlu1 %v1001_v58, %s1077_s12  ;;  %v422_v14 = vsel %vm243_vm8, %v420_v7, %v421_v4  ;;  %v1026_v15 = vpack.i.bf16 %v355_v1, %v356_v12 }
 0x18c   :  { %906 = vmatprep.mubr.msk.f32.mxu0 %vm247_vm10, %v422_v14 }
 0x18d   :  { %907 = vmatmul.mubr.msk.f32.gmra.mrb[8].mxu0 %vm247_vm10, %v1201_v50 }
 0x18f   :  { %1007 = vrot.lane.b32.xlu1 %v1006_v61, %s1075_s0  ;;  %1012 = vrot.lane.b32.xlu0 %v1011_v8, %s1076_s2 }
 0x193   :  { %1022 = vrot.lane.b32.xlu1 %v1021_v9, %s1076_s2  ;;  %1017 = vrot.lane.b32.xlu0 %v1016_v11, %s1077_s12 }
 0x197   :  { %1027 = vrot.lane.b32.xlu0 %v1026_v15, %s1077_s12 }
 0x1f2   :  { %v978_v16 = vpop.permute.xlu1 %977 }
 0x1f3   :  { %v980_v27 = vunpack.i.h.bf16 %v978_v16  ;;  %v979_v28 = vunpack.i.l.bf16 %v978_v16 }
 0x1f5   :  { %v983_v17 = vpop.permute.xlu0 %982 }
 0x1f6   :  { %v985_v21 = vunpack.i.h.bf16 %v983_v17  ;;  %v984_v23 = vunpack.i.l.bf16 %v983_v17 }
 0x1f8   :  { %v249_v24 = vsel %vm247_vm10, %v1172_v18, %v985_v21  ;;  %v248_v25 = vsel %vm247_vm10, %v1174_v22, %v984_v23  ;;  %v255_v26 = vsel %vm247_vm10, %v241_v20, %v984_v23  ;;  %v256_v29 = vsel %vm247_vm10, %v241_v20, %v985_v21 }
 0x1f9   :  { %v998_v30 = vpop.permute.xlu1 %997  ;;  %v988_v31 = vpop.permute.xlu0 %987  ;;  %v250_v37 = vsel %vm99_vm0, %v248_v25, %v979_v28  ;;  %v251_v40 = vsel %vm99_vm0, %v249_v24, %v980_v27  ;;  %v257_v41 = vsel %vm99_vm0, %v255_v26, %v979_v28  ;;  %v326_v22 = vrot.slane %v1185_v34, 6 }
 0x1fa   :  { %v1000_v32 = vunpack.i.h.bf16 %v998_v30  ;;  %v999_v33 = vunpack.i.l.bf16 %v998_v30  ;;  %v990_v35 = vunpack.i.h.bf16 %v988_v31  ;;  %v989_v36 = vunpack.i.l.bf16 %v988_v31 }
 0x1fb   :  { %v258_v45 = vsel %vm99_vm0, %v256_v29, %v980_v27 }
 0x1fc   :  { %v289_v42 = vsel %vm247_vm10, %v1191_v39, %v1000_v32  ;;  %v288_v43 = vsel %vm247_vm10, %v1172_v18, %v999_v33  ;;  %v294_v44 = vsel %vm247_vm10, %v282_v38, %v999_v33  ;;  %v295_v46 = vsel %vm247_vm10, %v1210_v54, %v1000_v32 }
 0x1fd   :  { %v253_v47 = vsel %vm252_vm12, %v250_v37, %v989_v36  ;;  %v254_v48 = vsel %vm252_vm12, %v251_v40, %v990_v35  ;;  %v1003_v49 = vpop.permute.xlu1 %1002  ;;  %v290_v51 = vsel %vm99_vm0, %v288_v43, %v980_v27  ;;  %v993_v39 = vpop.permute.xlu0 %992  ;;  %v296_v55 = vsel %vm99_vm0, %v294_v44, %v980_v27 }
 0x1fe   :  { %v1005_v52 = vunpack.i.h.bf16 %v1003_v49  ;;  %v1004_v53 = vunpack.i.l.bf16 %v1003_v49  ;;  %v994_v18 = vunpack.i.l.bf16 %v993_v39  ;;  %v259_v38 = vsel %vm252_vm12, %v257_v41, %v989_v36 }
 0x1ff   :  { %v260_v57 = vsel %vm252_vm12, %v258_v45, %v990_v35  ;;  %v385_v58 = vrot.slane %v253_v47, 2  ;;  %v386_v59 = vrot.slane %v254_v48, 2  ;;  %v995_v60 = vunpack.i.h.bf16 %v993_v39 }
 0x200   :  { %v298_v54 = vsel %vm252_vm12, %v296_v55, %v1004_v53  ;;  %v291_v61 = vsel %vm99_vm0, %v289_v42, %v994_v18  ;;  %v297_v62 = vsel %vm99_vm0, %v295_v46, %v994_v18  ;;  %v388_v63 = vrot.slane %v259_v38, 2 }
 0x201   :  { %v389_v0 = vrot.slane %v260_v57, 2  ;;  %v1008_v1 = vpop.permute.xlu1 %1007  ;;  %v1013_v3 = vpop.permute.xlu0 %1012  ;;  %v387_v4 = vsel %vm243_vm8, %v385_v58, %v386_v59  ;;  %v299_v5 = vsel %vm252_vm12, %v297_v62, %v1005_v52  ;;  %v292_v6 = vsel %vm252_vm12, %v290_v51, %v1004_v53 }
 0x202   :  { %v1009_v7 = vunpack.i.l.bf16 %v1008_v1  ;;  %v1015_v8 = vunpack.i.h.bf16 %v1013_v3  ;;  %v1014_v9 = vunpack.i.l.bf16 %v1013_v3  ;;  %v403_v11 = vrot.slane %v298_v54, 6 }
 0x203   :  { %v390_v10 = vsel %vm243_vm8, %v388_v63, %v389_v0  ;;  %v404_v12 = vrot.slane %v299_v5, 6  ;;  %v293_v14 = vsel %vm252_vm12, %v291_v61, %v1005_v52  ;;  %v1010_v21 = vunpack.i.h.bf16 %v1008_v1 }
 0x204   :  { %547 = vmatprep.mubr.f32.mxu1 %v390_v10  ;;  %v332_v15 = vsel %vm247_vm10, %v1213_v56, %v1015_v8  ;;  %v338_v16 = vsel %vm247_vm10, %v326_v22, %v1015_v8  ;;  %v331_v17 = vsel %vm247_vm10, %v1185_v34, %v1014_v9  ;;  %v337_v20 = vsel %vm247_vm10, %v326_v22, %v1014_v9 }
 0x205   :  { %548 = vmatmul.mubr.f32.vlgmr.msra.gmra.mrb[0].mxu1 %v387_v4  ;;  %v1023_v23 = vpop.permute.xlu1 %1022  ;;  %v1018_v24 = vpop.permute.xlu0 %1017  ;;  %v333_v25 = vsel %vm99_vm0, %v331_v17, %v995_v60  ;;  %v334_v26 = vsel %vm99_vm0, %v332_v15, %v1009_v7  ;;  %v339_v27 = vsel %vm99_vm0, %v337_v20, %v995_v60  ;;  %v340_v32 = vsel %vm99_vm0, %v338_v16, %v1009_v7 }
 0x206   :  { %v1025_v28 = vunpack.i.h.bf16 %v1023_v23  ;;  %v1024_v29 = vunpack.i.l.bf16 %v1023_v23  ;;  %v1020_v30 = vunpack.i.h.bf16 %v1018_v24  ;;  %v1019_v31 = vunpack.i.l.bf16 %v1018_v24 }
 0x207   :  { %v405_v34 = vsel %vm281_vm11, %v403_v11, %v404_v12  ;;  %v400_v33 = vrot.slane %v292_v6, 6  ;;  %v401_v35 = vrot.slane %v293_v14, 6  ;;  %v1318_v5 = vshrl.u32 %v53_v19, 7 }
 0x208   :  { %v370_v36 = vsel %vm247_vm10, %v1201_v50, %v1025_v28  ;;  %v376_v37 = vsel %vm247_vm10, %v1235_v13, %v1025_v28  ;;  %v369_v40 = vsel %vm247_vm10, %v1213_v56, %v1024_v29  ;;  %v375_v41 = vsel %vm247_vm10, %v363_v2, %v1024_v29  ;;  %552 = vmatprep.mubr.f32.mxu1 %v405_v34 }
 0x209   :  { %v335_v22 = vsel %vm252_vm12, %v333_v25, %v1019_v31  ;;  %v336_v42 = vsel %vm252_vm12, %v334_v26, %v1020_v30  ;;  %v341_v43 = vsel %vm252_vm12, %v339_v27, %v1019_v31  ;;  %v342_v44 = vsel %vm252_vm12, %v340_v32, %v1020_v30  ;;  %v1028_v50 = vpop.permute.xlu0 %1027 }
 0x20a   :  { %v402_v45 = vsel %vm281_vm11, %v400_v33, %v401_v35  ;;  %v371_v13 = vsel %vm99_vm0, %v369_v40, %v1009_v7  ;;  %v372_v46 = vsel %vm99_vm0, %v370_v36, %v1010_v21  ;;  %v377_v56 = vsel %vm99_vm0, %v375_v41, %v1009_v7 }
 0x20b   :  { %553 = vmatmul.mubr.f32.gmra.mrb[2].mxu1 %v402_v45  ;;  %v1030_v2 = vunpack.i.h.bf16 %v1028_v50  ;;  %v1029_v47 = vunpack.i.l.bf16 %v1028_v50  ;;  %v417_v48 = vrot.slane %v341_v43, 2  ;;  %v378_v49 = vsel %vm99_vm0, %v376_v37, %v1010_v21 }
 0x20c   :  { %v418_v51 = vrot.slane %v342_v44, 2  ;;  %v414_v39 = vrot.slane %v335_v22, 2  ;;  %v415_v52 = vrot.slane %v336_v42, 2  ;;  %v656_v7 = vstv %s655_s13 }
 0x20d   :  { %v374_v53 = vsel %vm252_vm12, %v372_v46, %v1030_v2  ;;  %v380_v55 = vsel %vm252_vm12, %v378_v49, %v1030_v2  ;;  %v373_v18 = vsel %vm252_vm12, %v371_v13, %v1029_v47  ;;  %v379_v38 = vsel %vm252_vm12, %v377_v56, %v1029_v47 }
 0x20e   :  { %v419_v57 = vsel %vm243_vm8, %v417_v48, %v418_v51  ;;  %v416_v58 = vsel %vm243_vm8, %v414_v39, %v415_v52  ;;  %v432_v59 = vrot.slane %v379_v38, 6  ;;  %v433_v54 = vrot.slane %v380_v55, 6  ;;  %v699_v38 = vld [vmem:[%s1355_s4 + $0x4] ss:$0 sm:$0xff] }
 0x20f   :  { %557 = vmatprep.mubr.f32.mxu1 %v419_v57  ;;  %v429_v60 = vrot.slane %v373_v18, 6  ;;  %v430_v61 = vrot.slane %v374_v53, 6  ;;  %vm657_vm13 = vcmp.lt.s32.totalorder %v1318_v5, %v656_v7  ;;  %v666_v14 = vstv %s800_s14 }
 0x210   :  { %558 = vmatmul.mubr.f32.gmra.mrb[4].mxu1 %v416_v58  ;;  %v434_v62 = vsel %vm281_vm11, %v432_v59, %v433_v54  ;;  %vm667_vm14 = vcmp.lt.s32.totalorder %v1318_v5, %v666_v14  ;;  %v676_v24 = vstv %s801_s15  ;;  %v686_v34 = vstv %s802_s3 }
 0x211   :  { %562 = vmatprep.mubr.f32.mxu1 %v434_v62  ;;  %v431_v63 = vsel %vm281_vm11, %v429_v60, %v430_v61  ;;  %vm677_vm15 = vcmp.lt.s32.totalorder %v1318_v5, %v676_v24  ;;  %vm687_vm0 = vcmp.lt.s32.totalorder %v1318_v5, %v686_v34  ;;  %v712_v57 = vsub.s32 0, %v1318_v5  ;;  %v803_v60 = vld [vmem:[%s1355_s4 + $0x1] ss:$8 sm:$0x7] }
 0x212   :  { %v716_v58 = vsub.s32 1, %v1318_v5  ;;  %v720_v59 = vsub.s32 2, %v1318_v5  ;;  %v708_v61 = vld [vmem:[%s1355_s4] ss:$8 sm:$0x7] }
 0x214   :  { %563 = vmatmul.mubr.f32.gmra.mrb[6].mxu1 %v431_v63  ;;  %v717_v5 = vrot.slane %v708_v61, %v716_v58 }
 0x258   :  { %v905_v0 = vpop.f32.mrb[6].mxu0 }
 0x259   :  { %v634_v1 = vpop.f32.mrb[7].mxu0 }
 0x260   :  { %v908_v3 = vpop.f32.mrb[8].mxu0 }
 0x261   :  { %v644_v4 = vpop.f32.mrb[9].mxu0 }
 0x2d8   :  { %v850_v6 = vpop.f32.mrb[0].mxu1 }
 0x2d9   :  { %v851_v8 = vpop.f32.mrb[1].mxu1 }
 0x2da   :  { %v852_v9 = vadd.f32 %v851_v8, %v850_v6  ;;  %v721_v6 = vrot.slane %v708_v61, %v720_v59 }
 0x2dc   :  { %v635_v10 = vadd.f32 %v852_v9, %v634_v1  ;;  %v713_v1 = vrot.slane %v708_v61, %v712_v57 }
 0x2de   :  { %v658_v11 = vsel %vm657_vm13, %v635_v10, -3.4028235e+38  ;;  %v853_v12 = vpop.f32.mrb[2].mxu1 }
 0x2df   :  { %v659_v15 = vrot.slane %v658_v11, 4  ;;  %v854_v16 = vpop.f32.mrb[3].mxu1 }
 0x2e0   :  { %v855_v17 = vadd.f32 %v854_v16, %v853_v12 }
 0x2e1   :  { %v660_v20 = vmax.f32 %v658_v11, %v659_v15 }
 0x2e2   :  { %v640_v19 = vadd.f32 %v905_v0, %v855_v17  ;;  %v741_v0 = vrot.slane %v803_v60, %v712_v57 }
 0x2e3   :  { %v661_v21 = vrot.slane %v660_v20, 2  ;;  %v856_v23 = vpop.f32.mrb[4].mxu1 }
 0x2e4   :  { %v668_v25 = vsel %vm667_vm14, %v640_v19, -3.4028235e+38  ;;  %v857_v26 = vpop.f32.mrb[5].mxu1 }
 0x2e5   :  { %v669_v27 = vrot.slane %v668_v25, 4  ;;  %v858_v28 = vadd.f32 %v857_v26, %v856_v23  ;;  %v662_v29 = vmax.f32 %v660_v20, %v661_v21 }
 0x2e7   :  { %v670_v30 = vmax.f32 %v668_v25, %v669_v27  ;;  %v645_v31 = vadd.f32 %v858_v28, %v644_v4  ;;  %v859_v32 = vpop.f32.mrb[6].mxu1  ;;  %v663_v41 = vrot.slane %v662_v29, 1  ;;  %v749_v4 = vrot.slane %v803_v60, %v720_v59 }
 0x2e8   :  { %v860_v33 = vpop.f32.mrb[7].mxu1 }
 0x2e9   :  { %v671_v35 = vrot.slane %v670_v30, 2  ;;  %v678_v36 = vsel %vm677_vm15, %v645_v31, -3.4028235e+38  ;;  %v861_v37 = vadd.f32 %v860_v33, %v859_v32  ;;  %v664_v46 = vmax.f32 %v662_v29, %v663_v41 }
 0x2ea   :  { %v679_v40 = vrot.slane %v678_v36, 4 }
 0x2eb   :  { %v672_v22 = vmax.f32 %v670_v30, %v671_v35  ;;  %v650_v42 = vadd.f32 %v908_v3, %v861_v37  ;;  %v745_v3 = vrot.slane %v803_v60, %v716_v58  ;;  %v765_v30 = vld [vmem:[%s1355_s4 + $0xc] ss:$0 sm:$0xff] }
 0x2ec   :  { %v680_v43 = vmax.f32 %v678_v36, %v679_v40 }
 0x2ed   :  { %v673_v44 = vrot.slane %v672_v22, 1  ;;  %v688_v50 = vsel %vm687_vm0, %v650_v42, -3.4028235e+38 }
 0x2ee   :  { %v681_v45 = vrot.slane %v680_v43, 2  ;;  %v689_v13 = vrot.slane %v688_v50, 4 }
 0x2ef   :  { %v674_v56 = vmax.f32 %v672_v22, %v673_v44 }
 0x2f0   :  { %v682_v2 = vmax.f32 %v680_v43, %v681_v45  ;;  %v690_v47 = vmax.f32 %v688_v50, %v689_v13 }
 0x2f1   :  { %v695_v48 = vsel %vm215_vm7, %v664_v46, %v674_v56 }
 0x2f2   :  { %v683_v49 = vrot.slane %v682_v2, 1  ;;  %v691_v51 = vrot.slane %v690_v47, 2 }
 0x2f4   :  { %v684_v39 = vmax.f32 %v682_v2, %v683_v49  ;;  %v692_v52 = vmax.f32 %v690_v47, %v691_v51 }
 0x2f6   :  { %v696_v53 = vsel %vm281_vm11, %v695_v48, %v684_v39  ;;  %v693_v55 = vrot.slane %v692_v52, 1 }
 0x2f8   :  { %v694_v18 = vmax.f32 %v692_v52, %v693_v55 }
 0x2fa   :  { %v698_v54 = vsel %vm697_vm1, %v696_v53, %v694_v18 }
 0x2fb   :  { %v700_v62 = vadd.f32 %v699_v38, %v698_v54 }
 0x2fd   :  { %v702_v63 = vrot.slane %v700_v62, 2 }
 0x2ff   :  { %v704_v7 = vadd.f32 %v702_v63, %v700_v62  ;;  %v705_v8 = vsub.f32 %v700_v62, %v702_v63  ;;  %v707_v9 = vmul.f32 %v702_v63, %v700_v62 }
 0x301   :  { %v706_v10 = vand.u32 2147483647, %v705_v8  ;;  %v753_v11 = vmul.f32 %v741_v0, %v704_v7  ;;  %v725_v12 = vmul.f32 %v713_v1, %v704_v7  ;;  %v755_v15 = vmul.f32 %v749_v4, %v707_v9 }
 0x302   :  { %v727_v17 = vmul.f32 %v721_v6, %v707_v9 }
 0x303   :  { %v754_v14 = vmul.f32 %v745_v3, %v706_v10  ;;  %v726_v16 = vmul.f32 %v717_v5, %v706_v10  ;;  %v756_v20 = vsel %vm281_vm11, %v753_v11, 0.0  ;;  %v728_v21 = vsel %vm281_vm11, %v725_v12, 0.0 }
 0x304   :  { %v759_v26 = vsel %vm281_vm11, %v755_v15, 0.0  ;;  %v731_v27 = vsel %vm281_vm11, %v727_v17, 0.0 }
 0x305   :  { %v757_v19 = vsel %vm281_vm11, %v754_v14, 0.0  ;;  %v729_v23 = vsel %vm281_vm11, %v726_v16, 0.0 }
 0x306   :  { %v758_v24 = vadd.f32 %v757_v19, %v756_v20  ;;  %v730_v25 = vadd.f32 %v729_v23, %v728_v21 }
 0x308   :  { %v760_v28 = vadd.f32 %v759_v26, %v758_v24  ;;  %v732_v29 = vadd.f32 %v731_v27, %v730_v25 }
 0x30a   :  { %761 = vadd.xlane.f32.xlu0 %v760_v28  ;;  %733 = vadd.xlane.f32.xlu1 %v732_v29 }
 0x397   :  { %v762_v31 = vpop.xlane.xlu0 %761  ;;  %v734_v32 = vpop.xlane.xlu1 %733 }
 0x398   :  { %v764_v34 = vsel %vm763_vm2, %v734_v32, %v762_v31 }
 0x399   :  { %v766_v33 = vadd.f32 %v765_v30, %v764_v34 }
 0x39b   :  { %v768_v35 = vsel %vm767_vm3, %v766_v33, 0.0 }
 0x39c   :  { %v770_v36 = vrot.slane %v768_v35, 4 }
 0x39e   :  { %v773_v37 = vsel %vm772_vm4, %v700_v62, %v770_v36 }
 0x39f   :  { %v774_v40 = vsel %vm243_vm8, %v773_v37, 0.0 }
 0x3a0   :  { %775 = vst [vmem:[%s1356_s5] sm:$0xff] %v774_v40 }
 0x3a1   :  { %780 = vsyncpa [#allocation3], 1 }
 0x3a2   :  { %781 = vsyncpa [#allocation4], 1 }

</bundles_post_ra>
